<compile_context>
chip_gen: v6e
topology: v6e:2x2x1
jax: 0.10.0
libtpu: 0.0.40
codegen_flags: <defaults>
</compile_context>

<pallas_src>
import typing

import numpy as np
import jax
import jax.numpy as jnp
from jax.experimental import pallas as pl
from jax.experimental.pallas import tpu as pltpu


def _round_up(x: int, m: int) -> int:
    return ((x + m - 1) // m) * m


# ----------------------------------------------------------------------------
# Pallas kernel: in-VMEM frame assembly + one fused windowed-DFT MXU matmul
# ----------------------------------------------------------------------------
def _make_stft_kernel(tm: int, hop: int, k_chunks: int):
    def kernel(chunks_ref, basis_ref, out_ref, frames_scr):
        # chunks_ref : (n_chunks, hop)   whole signal row, VMEM resident
        # basis_ref  : (n_fft, n_cols)   fused windowed DFT basis, resident
        # out_ref    : (tm, n_cols)      frame tile of the output
        # frames_scr : (tm, n_fft)       frame tile staging buffer
        i = pl.program_id(1)                      # frame-tile index in this row
        base = pl.multiple_of(i * tm, 8)          # first chunk row of the tile
        # Frame (i*tm + t) = concat_j chunks[i*tm + t + j], so the j-th hop-wide
        # column slice of the whole tile is chunk rows [base + j, base + j + tm).
        for j in range(k_chunks):                 # k_chunks = n_fft // hop (small)
            frames_scr[:, j * hop:(j + 1) * hop] = (
                chunks_ref[pl.ds(base + j, tm), :].astype(frames_scr.dtype))
        out_ref[...] = jnp.dot(frames_scr[...], basis_ref[...],
                               preferred_element_type=jnp.float32)
    return kernel


def _stft_matmul(chunks, basis, *, T, tm, hop, k_chunks, n_fft, n_cols,
                 compute_dtype):
    """chunks: (R, n_chunks, hop) f32; basis: (n_fft, n_cols) compute_dtype.
    Returns (R, T, n_cols) f32 = overlapping_frames @ basis, with the frames
    assembled inside the kernel (never materialized in HBM)."""
    R, n_chunks, _ = chunks.shape
    nt = -(-T // tm)

    flops = 2 * R * T * n_fft * n_cols
    bytes_accessed = (chunks.size * chunks.dtype.itemsize
                      + basis.size * basis.dtype.itemsize
                      + R * T * n_cols * 4)

    return pl.pallas_call(
        _make_stft_kernel(tm, hop, k_chunks),
        out_shape=jax.ShapeDtypeStruct((R, T, n_cols), jnp.float32),
        grid_spec=pltpu.PrefetchScalarGridSpec(
            num_scalar_prefetch=0,
            grid=(R, nt),
            in_specs=[
                # Whole signal row; block index only changes with r, so it is
                # DMA'd HBM->VMEM once per row and reused for every frame tile.
                pl.BlockSpec((None, n_chunks, hop), lambda r, i: (r, 0, 0)),
                # Fused windowed DFT basis, resident for the whole grid.
                pl.BlockSpec((n_fft, n_cols), lambda r, i: (0, 0)),
            ],
            # Exact output width (2*n_freq): no padded columns to slice off.
            out_specs=pl.BlockSpec((None, tm, n_cols), lambda r, i: (r, i, 0)),
            scratch_shapes=[pltpu.VMEM((tm, n_fft), compute_dtype)],
        ),
        compiler_params=pltpu.CompilerParams(
            dimension_semantics=("parallel", "parallel")),
        cost_estimate=pl.CostEstimate(flops=flops, transcendentals=0,
                                      bytes_accessed=bytes_accessed),
    )(chunks, basis)


# ----------------------------------------------------------------------------
# JAX wrapper mirroring the PyTorch Stft module
# ----------------------------------------------------------------------------
class StftPallas:
    def __init__(self,
                 n_fft: int = 512,
                 win_length: typing.Union[int, None] = 512,
                 hop_length: int = 128,
                 center: bool = True,
                 pad_mode: str = "reflect",
                 normalized: bool = False,
                 onesided: bool = True,
                 kaldi_padding_mode: bool = False,
                 use_bf16_matmul: bool = False,
                 max_row_tile: int = 512):
        self.n_fft = n_fft
        self.win_length = n_fft if win_length is None else win_length
        self.hop_length = hop_length
        self.center = center
        self.pad_mode = pad_mode
        self.normalized = normalized
        self.onesided = onesided
        self.kaldi_padding_mode = kaldi_padding_mode
        if self.kaldi_padding_mode:
            self.win_length = 400
        # bf16 MXU inputs with f32 accumulation: ~2-4x matmul throughput on
        # v6e/v7x, ~1e-3-relative output error; default off for bit-tight use.
        self.compute_dtype = jnp.bfloat16 if use_bf16_matmul else jnp.float32
        self.max_row_tile = max_row_tile

        self.n_freq = n_fft // 2 + 1 if onesided else n_fft
        self.n_cols = 2 * self.n_freq              # (real, imag) interleaved

        # torch.stft(window=None): rectangular window of win_length, centered
        # (zero-padded) inside n_fft.
        win = np.zeros(n_fft, dtype=np.float64)
        left = (n_fft - self.win_length) // 2
        win[left:left + self.win_length] = 1.0

        # Fused windowed onesided DFT basis, real/imag interleaved columns:
        #   out[:, 2f]   = sum_k win[k] x[k]  cos(2*pi*k*f/N)
        #   out[:, 2f+1] = sum_k win[k] x[k] (-sin(2*pi*k*f/N))
        k = np.arange(n_fft, dtype=np.float64)[:, None]
        f = np.arange(self.n_freq, dtype=np.float64)[None, :]
        ang = 2.0 * np.pi * k * f / n_fft
        basis = np.empty((n_fft, self.n_cols), dtype=np.float64)
        basis[:, 0::2] = np.cos(ang)
        basis[:, 1::2] = -np.sin(ang)
        basis *= win[:, None]                      # fold window into basis
        if self.normalized:
            basis *= 1.0 / np.sqrt(n_fft)          # fold normalization too
        self.basis = jnp.asarray(basis, dtype=self.compute_dtype)

    # ------------------------------------------------------------------
    def _row_tile(self, T: int, R: int) -> int:
        # Keep >= ~4 total grid steps (v7x's two TensorCores + DMA pipeline)
        # without padding tiny workloads up to the 512 cap.
        nt_target = max(1, -(-4 // max(R, 1)))
        tm = -(-T // nt_target)
        tm = min(self.max_row_tile, _round_up(max(tm, 1), 8))
        return max(tm, 8)

    # ------------------------------------------------------------------
    def _stft_core(self, x: jax.Array) -> jax.Array:
        """x: (R, n_padded_samples) f32 -> (R, Frames, 2*n_freq) f32."""
        R, n = x.shape
        hop, n_fft = self.hop_length, self.n_fft
        T = 1 + (n - n_fft) // hop
        tm = self._row_tile(T, R)
        nt = -(-T // tm)

        if n_fft % hop == 0:
            # Fast path: frames never hit HBM.  Reshape the signal into
            # hop-wide chunks; the kernel gathers K consecutive chunk rows per
            # frame.  Zero-pad the tail so the last (partial) frame tile only
            # reads in-bounds chunk rows.
            k_chunks, hop_k = n_fft // hop, hop
            need_chunks = nt * tm + k_chunks - 1
            n_chunks = max(need_chunks, -(-n // hop))
            pad = n_chunks * hop - n
            if pad:
                x = jnp.pad(x, ((0, 0), (0, pad)))
            chunks = x.reshape(R, n_chunks, hop)
        else:
            # TODO(synk): hop values that do not divide n_fft fall back to a
            # gather-framed HBM array (Kx blowup); stream spans via manual DMA
            # if this configuration ever matters.
            k_chunks, hop_k = 1, n_fft
            starts = jnp.arange(T) * hop
            idx = starts[:, None] + jnp.arange(n_fft)[None, :]
            chunks = x[:, idx]                                  # (R, T, n_fft)
            pad = nt * tm - T
            if pad:
                chunks = jnp.pad(chunks, ((0, 0), (0, pad), (0, 0)))

        return _stft_matmul(chunks, self.basis, T=T, tm=tm, hop=hop_k,
                            k_chunks=k_chunks, n_fft=n_fft, n_cols=self.n_cols,
                            compute_dtype=self.compute_dtype)

    # ------------------------------------------------------------------
    def __call__(self, inputs: jax.Array,
                 ilens: typing.Optional[jax.Array] = None):
        """inputs: (B, Nsamples) or (B, Nsamples, C) ->
        (B, Frames, Freq, 2) or (B, Frames, C, Freq, 2) [, olens]."""
        bs = inputs.shape[0]
        if inputs.ndim == 3:
            multi_channel = True
            nsamp = inputs.shape[1]
            x = jnp.transpose(inputs, (0, 2, 1)).reshape(-1, nsamp)  # (B*C, N)
        else:
            multi_channel = False
            x = inputs
        x = x.astype(jnp.float32)

        if not self.kaldi_padding_mode:
            if self.center:
                pad = self.n_fft // 2
                x = jnp.pad(x, ((0, 0), (pad, pad)), mode=self.pad_mode)
        else:
            num_pads = self.n_fft - self.win_length
            x = jnp.pad(x, ((0, 0), (num_pads, 0)))

        flat = self._stft_core(x)                      # (R, T, 2*n_freq) f32
        R, T, _ = flat.shape
        out = flat.reshape(R, T, self.n_freq, 2)

        if multi_channel:
            # (B*C, T, F, 2) -> (B, C, T, F, 2) -> (B, T, C, F, 2)
            out = out.reshape(bs, -1, T, self.n_freq, 2)
            out = jnp.transpose(out, (0, 2, 1, 3, 4))

        if ilens is not None:
            ilens = ilens.astype(jnp.int32)
            if self.center:
                # Mirrors the torch module: olens math uses win_length//2 even
                # though the signal is center-padded by n_fft//2.
                pad = self.win_length // 2
                ilens = ilens + 2 * pad
            olens = (ilens - self.win_length) // self.hop_length + 1
            frame_idx = jnp.arange(out.shape[1], dtype=jnp.int32)
            mask = frame_idx[None, :] >= olens[:, None]           # (B, Frames)
            mask = mask.reshape(mask.shape + (1,) * (out.ndim - 2))
            out = jnp.where(mask, 0.0, out)
            return out, olens
        return out, None


# ----------------------------------------------------------------------------
# Demo
# ----------------------------------------------------------------------------
if __name__ == "__main__":
    key = jax.random.PRNGKey(0)
    B, NSAMP = 2, 2048
    N_FFT, HOP = 512, 128                      # module defaults
    N_FREQ = N_FFT // 2 + 1

    inputs = jax.random.normal(key, (B, NSAMP), dtype=jnp.float32)
    ilens = jnp.array([NSAMP, NSAMP - 300], dtype=jnp.int32)

    stft = StftPallas(n_fft=N_FFT, win_length=N_FFT, hop_length=HOP,
                      center=True, pad_mode="reflect",
                      normalized=False, onesided=True)
    out, olens = stft(inputs, ilens)
    out = np.asarray(jax.block_until_ready(out))
    olens = np.asarray(jax.block_until_ready(olens))

    # Pure-numpy float64 reference: gather framing + separate cos / -sin
    # matmuls (rectangular window == 1).
    x_np = np.asarray(inputs, dtype=np.float64)
    pad = N_FFT // 2
    xp = np.pad(x_np, ((0, 0), (pad, pad)), mode="reflect")
    T = 1 + (xp.shape[1] - N_FFT) // HOP
    idx = (np.arange(T) * HOP)[:, None] + np.arange(N_FFT)[None, :]
    fr = xp[:, idx]                                            # (B, T, n_fft)
    ang = (2.0 * np.pi * np.arange(N_FFT)[:, None]
           * np.arange(N_FREQ)[None, :] / N_FFT)
    ref = np.stack([np.einsum("btk,kf->btf", fr, np.cos(ang)),
                    np.einsum("btk,kf->btf", fr, -np.sin(ang))], axis=-1)
    ref_olens = (np.asarray(ilens) + 2 * (N_FFT // 2) - N_FFT) // HOP + 1
    fmask = np.arange(T)[None, :] >= ref_olens[:, None]
    ref = np.where(fmask[:, :, None, None], 0.0, ref)

    assert out.shape == (B, T, N_FREQ, 2), out.shape
    np.testing.assert_array_equal(olens, ref_olens)
    np.testing.assert_allclose(out, ref, rtol=1e-4, atol=2e-3)

    # bf16-input / f32-accumulation perf path: same kernel, looser tolerance.
    stft_bf16 = StftPallas(n_fft=N_FFT, win_length=N_FFT, hop_length=HOP,
                           use_bf16_matmul=True)
    out_bf16, _ = stft_bf16(inputs, ilens)
    out_bf16 = np.asarray(jax.block_until_ready(out_bf16))
    err = float(np.max(np.abs(out_bf16 - ref)))
    assert err < 1.0, f"bf16 path error too large: {err}"

    print("KERNEL_OK")
</pallas_src>

<mosaic_0001>
module attributes {stable_mosaic.version = 11 : i64} {
  func.func @kernel(%arg0: i32, %arg1: i32, %arg2: memref<1x35x128xf32, #tpu.memory_space<vmem>>, %arg3: memref<512x514xf32, #tpu.memory_space<vmem>>, %arg4: memref<1x16x514xf32, #tpu.memory_space<vmem>>, %arg5: memref<16x512xf32, #tpu.memory_space<vmem>>) attributes {dimension_semantics = [#tpu.dimension_semantics<parallel>, #tpu.dimension_semantics<parallel>], iteration_bounds = array<i64: 2, 2>, scalar_prefetch = 0 : i64, scratch_operands = 1 : i64, tpu.core_type = #tpu.core_type<tc>, window_params = [{transform_indices = @transform_0, window_bounds = array<i64: 1, 35, 128>}, {pipeline_mode = #tpu.pipeline_mode<synchronous>, transform_indices = @transform_1, window_bounds = array<i64: 512, 514>}, {transform_indices = @transform_2, window_bounds = array<i64: 1, 16, 514>}]} {
    %c16_i32 = arith.constant 16 : i32
    %0 = arith.muli %arg1, %c16_i32 : i32
    %1 = tpu.assume_multiple %0, 8 : i32
    %c0_i32 = arith.constant 0 : i32
    %2 = arith.addi %1, %c0_i32 : i32
    %c0 = arith.constant 0 : index
    %3 = arith.index_cast %2 : i32 to index
    %c0_0 = arith.constant 0 : index
    %4 = vector.load %arg2[%c0, %3, %c0_0] : memref<1x35x128xf32, #tpu.memory_space<vmem>>, vector<1x16x128xf32>
    %5 = vector.shape_cast %4 : vector<1x16x128xf32> to vector<16x128xf32>
    %c0_1 = arith.constant 0 : index
    %c0_2 = arith.constant 0 : index
    %6 = vector.load %arg5[%c0_1, %c0_2] : memref<16x512xf32, #tpu.memory_space<vmem>>, vector<16x128xf32>
    tpu.vector_store %arg5[%c0_1, %c0_2], %5 {strides = array<i32>} : memref<16x512xf32, #tpu.memory_space<vmem>>, vector<16x128xf32>,
    %c1_i32 = arith.constant 1 : i32
    %7 = arith.addi %1, %c1_i32 : i32
    %c0_3 = arith.constant 0 : index
    %8 = arith.index_cast %7 : i32 to index
    %c0_4 = arith.constant 0 : index
    %9 = vector.load %arg2[%c0_3, %8, %c0_4] : memref<1x35x128xf32, #tpu.memory_space<vmem>>, vector<1x16x128xf32>
    %10 = vector.shape_cast %9 : vector<1x16x128xf32> to vector<16x128xf32>
    %c0_5 = arith.constant 0 : index
    %c128 = arith.constant 128 : index
    %11 = vector.load %arg5[%c0_5, %c128] : memref<16x512xf32, #tpu.memory_space<vmem>>, vector<16x128xf32>
    tpu.vector_store %arg5[%c0_5, %c128], %10 {strides = array<i32>} : memref<16x512xf32, #tpu.memory_space<vmem>>, vector<16x128xf32>,
    %c2_i32 = arith.constant 2 : i32
    %12 = arith.addi %1, %c2_i32 : i32
    %c0_6 = arith.constant 0 : index
    %13 = arith.index_cast %12 : i32 to index
    %c0_7 = arith.constant 0 : index
    %14 = vector.load %arg2[%c0_6, %13, %c0_7] : memref<1x35x128xf32, #tpu.memory_space<vmem>>, vector<1x16x128xf32>
    %15 = vector.shape_cast %14 : vector<1x16x128xf32> to vector<16x128xf32>
    %c0_8 = arith.constant 0 : index
    %c256 = arith.constant 256 : index
    %16 = vector.load %arg5[%c0_8, %c256] : memref<16x512xf32, #tpu.memory_space<vmem>>, vector<16x128xf32>
    tpu.vector_store %arg5[%c0_8, %c256], %15 {strides = array<i32>} : memref<16x512xf32, #tpu.memory_space<vmem>>, vector<16x128xf32>,
    %c3_i32 = arith.constant 3 : i32
    %17 = arith.addi %1, %c3_i32 : i32
    %c0_9 = arith.constant 0 : index
    %18 = arith.index_cast %17 : i32 to index
    %c0_10 = arith.constant 0 : index
    %19 = vector.load %arg2[%c0_9, %18, %c0_10] : memref<1x35x128xf32, #tpu.memory_space<vmem>>, vector<1x16x128xf32>
    %20 = vector.shape_cast %19 : vector<1x16x128xf32> to vector<16x128xf32>
    %c0_11 = arith.constant 0 : index
    %c384 = arith.constant 384 : index
    %21 = vector.load %arg5[%c0_11, %c384] : memref<16x512xf32, #tpu.memory_space<vmem>>, vector<16x128xf32>
    tpu.vector_store %arg5[%c0_11, %c384], %20 {strides = array<i32>} : memref<16x512xf32, #tpu.memory_space<vmem>>, vector<16x128xf32>,
    %c0_12 = arith.constant 0 : index
    %c0_13 = arith.constant 0 : index
    %22 = vector.load %arg5[%c0_12, %c0_13] : memref<16x512xf32, #tpu.memory_space<vmem>>, vector<16x512xf32>
    %c0_14 = arith.constant 0 : index
    %c0_15 = arith.constant 0 : index
    %23 = vector.load %arg3[%c0_14, %c0_15] : memref<512x514xf32, #tpu.memory_space<vmem>>, vector<512x514xf32>
    %cst = arith.constant dense<0.000000e+00> : vector<16x514xf32>
    %24 = tpu.matmul %22, %23, %cst {dimension_numbers = #tpu.dot_dimension_numbers<[1], [0], [0], [1], [0, 0, 1, 1], [], []>} : vector<16x512xf32>, vector<512x514xf32>, vector<16x514xf32> -> vector<16x514xf32>
    %c0_16 = arith.constant 0 : index
    %c0_17 = arith.constant 0 : index
    %c0_18 = arith.constant 0 : index
    %25 = vector.load %arg4[%c0_16, %c0_17, %c0_18] : memref<1x16x514xf32, #tpu.memory_space<vmem>>, vector<1x16x514xf32>
    %26 = vector.shape_cast %25 : vector<1x16x514xf32> to vector<16x514xf32>
    %27 = vector.shape_cast %24 : vector<16x514xf32> to vector<1x16x514xf32>
    tpu.vector_store %arg4[%c0_16, %c0_17, %c0_18], %27 {strides = array<i32>} : memref<1x16x514xf32, #tpu.memory_space<vmem>>, vector<1x16x514xf32>,
    return
  }
  func.func @transform_0(%arg0: i32, %arg1: i32) -> (i32, i32, i32) {
    %c0_i32 = arith.constant 0 : i32
    %c0_i32_0 = arith.constant 0 : i32
    %c0_i32_1 = arith.constant 0 : i32
    return %arg0, %c0_i32, %c0_i32_0 : i32, i32, i32
  }
  func.func @transform_1(%arg0: i32, %arg1: i32) -> (i32, i32) {
    %c0_i32 = arith.constant 0 : i32
    %c0_i32_0 = arith.constant 0 : i32
    %c0_i32_1 = arith.constant 0 : i32
    return %c0_i32, %c0_i32_0 : i32, i32
  }
  func.func @transform_2(%arg0: i32, %arg1: i32) -> (i32, i32, i32) {
    %c0_i32 = arith.constant 0 : i32
    %c0_i32_0 = arith.constant 0 : i32
    return %arg0, %arg1, %c0_i32 : i32, i32, i32
  }
}

</mosaic_0001>

<bundles_post_ra>
// kernel: tpu_custom_call.1
= control target key start
LH: loop header
LB: loop body
LE: loop exit
PB: predicated region body
PF: predicated region fallthrough
CT: control target
= control target key end

     0   :  { %s1553_s9 = smov 0   ;;  %s1555_s10 = smov 0   ;;  %s2745_s0 = inlined_call_operand.vmem [shape: f32[2,35,128], index: 0, kind: input, shape index: {}]   ;;  %s2746_s1 = inlined_call_operand.vmem [shape: f32[512,514], index: 1, kind: input, shape index: {}]   ;;  %s2747_s2 = inlined_call_operand.vmem [shape: f32[2,17,514], index: 2, kind: output, shape index: {}]  }
   0x1   :  { %s1557_s11 = smov 0   ;;  %s1559_s12 = smov 0  }
   0x2   :  { %s1561_s13 = smov 0   ;;  %s1563_s14 = smov 0  }
   0x3   :  { %s1565_s15 = smov 0  }
   0x4 LB: > { %s21_s16 = sadd.s32 1, %s1496_s13  ;;  %s24_s17 = sadd.s32 1, %s1500_s14  ;;  %s1504_s15 = sphi %s1565_s15, %s12_s15   ;;  %s1500_s14 = sphi %s1563_s14, %s2760_s14   ;;  %s1496_s13 = sphi %s1561_s13, %s2759_s13   ;;  %s1492_s12 = sphi %s1559_s12, %s2758_s12   ;;  %s1488_s11 = sphi %s1557_s11, %s2757_s11   ;;  %s1484_s10 = sphi %s1555_s10, %s2756_s10   ;;  %s1480_s9 = sphi %s1553_s9, %s2755_s9  }
   0x5   : > { %p22_p0 = scmp.ge.s32.totalorder %s21_s16, 2  ;;  %s1188_s18 = sadd.s32 4294967295, %s1504_s15  }
   0x6   : > { %p90_p1 = scmp.ne.s32.totalorder %s1484_s10, %s1480_s9  ;;  %p91_p2 = scmp.eq.s32.totalorder %s1188_s18, 3 }
   0x7   : > { %s2762_s16 = smov (%p22_p0, %s21_s16), 0  ;;  %s2764_s17 = smov (!%p22_p0, %s24_s17), %s1500_s14 }
   0x8   : > { %s76_s19 = ssub.s32 %s1496_s13, %s2762_s16  ;;  %p26_p3 = scmp.ge.s32.totalorder %s2764_s17, 2 }
   0x9   : > { %p1192_p4 = scmp.ge.s32.totalorder %s1504_s15, 1  ;;  %p1599_p5 = por %p91_p2, %p90_p1 }
   0xa   : > { %p126_p6 = scmp.lt.s32.totalorder %s1504_s15, 5  ;;  %s2766_s17 = smov (%p26_p3, %s2764_s17), 0 }
   0xb   : > { %s75_s21 = ssub.s32 %s1500_s14, %s2766_s17  ;;  %s80_s23 = sadd.s32 1, %s1484_s10 }
   0xc   : > { %p127_p7 = pnand %p1192_p4, %p126_p6  ;;  %s77_s22 = sor.u32 %s76_s19, %s75_s21 }
   0xd   : > { %p78_p8 = scmp.eq.s32.totalorder %s77_s22, 0  ;;  %p147_p9 = scmp.lt.s32.totalorder (!%p127_p7), %s1492_s12, 1 }
   0xe   : > { %130 = sbr.rel (%p127_p7) target bundleno = 433 (0x1b1), region = 28  ;;  %s1194_s26 = sshll.u32 (!%p127_p7), %s1488_s11, 4 }
   0xf   : > { %s1610_s24 = scalar_select %p78_p8, %s1484_s10, %s80_s23  }
  0x10   : > { %s144_s28 = sand.u32 (!%p127_p7), 1, %s1480_s9  }
  0x11   : > { %s1294_s29 = smul.u32 (!%p127_p7), 80, %s144_s28 }
  0x13   : > { %v266_v0 = vld [vmem:[%s2746_s1 + $0x260] sm:$0xff]  ;;  %v265_v2 = vld [vmem:[%s2746_s1 + $0x258] sm:$0xff]  ;;  %v260_v6 = vld [vmem:[%s2746_s1 + $0x230] sm:$0xff]  ;;  %s1916_s19 = scalar_select %p147_p9, %s1492_s12, 1  ;;  %vm972_vm0 = vcmask 15360  }
  0x14   : > { %v426_v1 = vld [vmem:[%s2746_s1 + $0x760] sm:$0xff]  ;;  %510 = vmatprep.subr.mxu0 %v266_v0  ;;  %v425_v3 = vld [vmem:[%s2746_s1 + $0x758] sm:$0xff]  ;;  %v420_v7 = vld [vmem:[%s2746_s1 + $0x730] sm:$0xff]  ;;  %s2634_s30 = scalar_lea.vmem [#allocation3], %s1294_s29   ;;  %s1204_s9 = sshll.u32 (%p1599_p5), %s1488_s11, 1 }
  0x15   : > { %587 = vmatprep.subr.mxu1 %v426_v1  ;;  %v261_v4 = vld [vmem:[%s2746_s1 + $0x238] sm:$0xff]  ;;  %511 = vmatpush1.msra.mxu0 %v265_v2  ;;  %v256_v8 = vld [vmem:[%s2746_s1 + $0x210] sm:$0xff]  ;;  %v255_v10 = vld [vmem:[%s2746_s1 + $0x208] sm:$0xff]  ;;  %s1295_s21 = smul.u32 40, %s1916_s19 }
  0x16   : > { %v421_v5 = vld [vmem:[%s2746_s1 + $0x738] sm:$0xff]  ;;  %588 = vmatpush1.msra.mxu1 %v425_v3  ;;  %512 = vmatprep.subr.mxu0 %v261_v4  ;;  %v416_v9 = vld [vmem:[%s2746_s1 + $0x710] sm:$0xff]  ;;  %v415_v11 = vld [vmem:[%s2746_s1 + $0x708] sm:$0xff]  ;;  %s1297_s19 = smul.u32 (%p1599_p5), 15, %s1492_s12 }
  0x17   : > { %589 = vmatprep.subr.mxu1 %v421_v5  ;;  %513 = vmatpush1.msra.mxu0 %v260_v6  ;;  %v251_v12 = vld [vmem:[%s2746_s1 + $0x1e8] sm:$0xff]  ;;  %v250_v14 = vld [vmem:[%s2746_s1 + $0x1e0] sm:$0xff]  ;;  %v245_v18 = vld [vmem:[%s2746_s1 + $0x1b8] sm:$0xff]  ;;  %s151_s25 = scalar_lea.vmem %s2745_s0, %s1295_s21 }
  0x18   : > { %590 = vmatpush1.msra.mxu1 %v420_v7  ;;  %v411_v13 = vld [vmem:[%s2746_s1 + $0x6e8] sm:$0xff]  ;;  %514 = vmatprep.subr.mxu0 %v256_v8  ;;  %v410_v15 = vld [vmem:[%s2746_s1 + $0x6e0] sm:$0xff]  ;;  %v405_v19 = vld [vmem:[%s2746_s1 + $0x6b8] sm:$0xff]  ;;  %s1989_s18 = scalar_lea.vmem %s151_s25, %s1194_s26  ;;  %s1296_s25 = smul.u32 (%p1599_p5), 10, %s1488_s11 }
  0x19   : > { %591 = vmatprep.subr.mxu1 %v416_v9  ;;  %515 = vmatpush1.msra.mxu0 %v255_v10  ;;  %v246_v16 = vld [vmem:[%s2746_s1 + $0x1c0] sm:$0xff]  ;;  %v241_v20 = vld [vmem:[%s2746_s1 + $0x198] sm:$0xff]  ;;  %v240_v22 = vld [vmem:[%s2746_s1 + $0x190] sm:$0xff]  ;;  %s987_s26 = ssub.s32 (%p1599_p5), 3, %s1204_s9 }
  0x1a   : > { %592 = vmatpush1.msra.mxu1 %v415_v11  ;;  %v406_v17 = vld [vmem:[%s2746_s1 + $0x6c0] sm:$0xff]  ;;  %516 = vmatprep.subr.mxu0 %v251_v12  ;;  %v401_v21 = vld [vmem:[%s2746_s1 + $0x698] sm:$0xff]  ;;  %v400_v23 = vld [vmem:[%s2746_s1 + $0x690] sm:$0xff]  ;;  %p988_p10 = scmp.lt.s32.totalorder (%p1599_p5), %s987_s26, 2  ;;  %s995_s3 = sadd.s32 (%p1599_p5), %s1297_s19, %s1296_s25 }
  0x1b   : > { %593 = vmatprep.subr.mxu1 %v411_v13  ;;  %517 = vmatpush1.msra.mxu0 %v250_v14  ;;  %v236_v24 = vld [vmem:[%s2746_s1 + $0x170] sm:$0xff]  ;;  %v235_v26 = vld [vmem:[%s2746_s1 + $0x168] sm:$0xff]  ;;  %v230_v30 = vld [vmem:[%s2746_s1 + $0x140] sm:$0xff]  ;;  %s1209_s4 = sshll.u32 (%p1599_p5), %s995_s3, 3 }
  0x1c   : > { %594 = vmatpush1.msra.mxu1 %v410_v15  ;;  %518 = vmatprep.subr.mxu0 %v246_v16  ;;  %v396_v25 = vld [vmem:[%s2746_s1 + $0x670] sm:$0xff]  ;;  %v395_v27 = vld [vmem:[%s2746_s1 + $0x668] sm:$0xff]  ;;  %v390_v31 = vld [vmem:[%s2746_s1 + $0x640] sm:$0xff] }
  0x1d   : > { %595 = vmatprep.subr.mxu1 %v406_v17  ;;  %519 = vmatpush1.msra.mxu0 %v245_v18  ;;  %v231_v28 = vld [vmem:[%s2746_s1 + $0x148] sm:$0xff]  ;;  %v226_v32 = vld [vmem:[%s2746_s1 + $0x120] sm:$0xff]  ;;  %v225_v34 = vld [vmem:[%s2746_s1 + $0x118] sm:$0xff] }
  0x1e   : > { %596 = vmatpush1.msra.mxu1 %v405_v19  ;;  %520 = vmatprep.subr.mxu0 %v241_v20  ;;  %v391_v29 = vld [vmem:[%s2746_s1 + $0x648] sm:$0xff]  ;;  %v386_v33 = vld [vmem:[%s2746_s1 + $0x620] sm:$0xff]  ;;  %v385_v35 = vld [vmem:[%s2746_s1 + $0x618] sm:$0xff] }
  0x1f   : > { %597 = vmatprep.subr.mxu1 %v401_v21  ;;  %521 = vmatpush1.msra.mxu0 %v240_v22  ;;  %v221_v36 = vld [vmem:[%s2746_s1 + $0xf8] sm:$0xff]  ;;  %v220_v38 = vld [vmem:[%s2746_s1 + $0xf0] sm:$0xff]  ;;  %v215_v42 = vld [vmem:[%s2746_s1 + $0xc8] sm:$0xff] }
  0x20   : > { %598 = vmatpush1.msra.mxu1 %v400_v23  ;;  %522 = vmatprep.subr.mxu0 %v236_v24  ;;  %v381_v37 = vld [vmem:[%s2746_s1 + $0x5f8] sm:$0xff]  ;;  %v380_v39 = vld [vmem:[%s2746_s1 + $0x5f0] sm:$0xff]  ;;  %v375_v43 = vld [vmem:[%s2746_s1 + $0x5c8] sm:$0xff] }
  0x21   : > { %599 = vmatprep.subr.mxu1 %v396_v25  ;;  %523 = vmatpush1.msra.mxu0 %v235_v26  ;;  %v216_v40 = vld [vmem:[%s2746_s1 + $0xd0] sm:$0xff]  ;;  %v211_v44 = vld [vmem:[%s2746_s1 + $0xa8] sm:$0xff]  ;;  %v210_v46 = vld [vmem:[%s2746_s1 + $0xa0] sm:$0xff] }
  0x22   : > { %600 = vmatpush1.msra.mxu1 %v395_v27  ;;  %524 = vmatprep.subr.mxu0 %v231_v28  ;;  %v376_v41 = vld [vmem:[%s2746_s1 + $0x5d0] sm:$0xff]  ;;  %v371_v45 = vld [vmem:[%s2746_s1 + $0x5a8] sm:$0xff]  ;;  %v370_v47 = vld [vmem:[%s2746_s1 + $0x5a0] sm:$0xff] }
  0x23   : > { %601 = vmatprep.subr.mxu1 %v391_v29  ;;  %525 = vmatpush1.msra.mxu0 %v230_v30  ;;  %v206_v48 = vld [vmem:[%s2746_s1 + $0x80] sm:$0xff]  ;;  %v205_v50 = vld [vmem:[%s2746_s1 + $0x78] sm:$0xff]  ;;  %v200_v54 = vld [vmem:[%s2746_s1 + $0x50] sm:$0xff] }
  0x24   : > { %602 = vmatpush1.msra.mxu1 %v390_v31  ;;  %526 = vmatprep.subr.mxu0 %v226_v32  ;;  %v366_v49 = vld [vmem:[%s2746_s1 + $0x580] sm:$0xff]  ;;  %v365_v51 = vld [vmem:[%s2746_s1 + $0x578] sm:$0xff]  ;;  %v360_v55 = vld [vmem:[%s2746_s1 + $0x550] sm:$0xff] }
  0x25   : > { %603 = vmatprep.subr.mxu1 %v386_v33  ;;  %527 = vmatpush1.msra.mxu0 %v225_v34  ;;  %v201_v52 = vld [vmem:[%s2746_s1 + $0x58] sm:$0xff]  ;;  %v196_v56 = vld [vmem:[%s2746_s1 + $0x30] sm:$0xff]  ;;  %v195_v58 = vld [vmem:[%s2746_s1 + $0x28] sm:$0xff] }
  0x26   : > { %604 = vmatpush1.msra.mxu1 %v385_v35  ;;  %528 = vmatprep.subr.mxu0 %v221_v36  ;;  %v361_v53 = vld [vmem:[%s2746_s1 + $0x558] sm:$0xff]  ;;  %v356_v57 = vld [vmem:[%s2746_s1 + $0x530] sm:$0xff]  ;;  %v355_v59 = vld [vmem:[%s2746_s1 + $0x528] sm:$0xff] }
  0x27   : > { %605 = vmatprep.subr.mxu1 %v381_v37  ;;  %529 = vmatpush1.msra.mxu0 %v220_v38  ;;  %v191_v60 = vld [vmem:[%s2746_s1 + $0x8] sm:$0xff]  ;;  %v190_v62 = vld [vmem:[%s2746_s1] sm:$0xff]  ;;  %v345_v2 = vld [vmem:[%s2746_s1 + $0x4d8] sm:$0xff] }
  0x28   : > { %606 = vmatpush1.msra.mxu1 %v380_v39  ;;  %530 = vmatprep.subr.mxu0 %v216_v40  ;;  %v351_v61 = vld [vmem:[%s2746_s1 + $0x508] sm:$0xff]  ;;  %v350_v63 = vld [vmem:[%s2746_s1 + $0x500] sm:$0xff]  ;;  %v505_v3 = vld [vmem:[%s2746_s1 + $0x9d8] sm:$0xff] }
  0x29   : > { %607 = vmatprep.subr.mxu1 %v376_v41  ;;  %531 = vmatpush1.msra.mxu0 %v215_v42  ;;  %v346_v0 = vld [vmem:[%s2746_s1 + $0x4e0] sm:$0xff]  ;;  %v341_v4 = vld [vmem:[%s2746_s1 + $0x4b8] sm:$0xff]  ;;  %v340_v6 = vld [vmem:[%s2746_s1 + $0x4b0] sm:$0xff] }
  0x2a   : > { %608 = vmatpush1.msra.mxu1 %v375_v43  ;;  %532 = vmatprep.subr.mxu0 %v211_v44  ;;  %v506_v1 = vld [vmem:[%s2746_s1 + $0x9e0] sm:$0xff]  ;;  %v501_v5 = vld [vmem:[%s2746_s1 + $0x9b8] sm:$0xff]  ;;  %v500_v7 = vld [vmem:[%s2746_s1 + $0x9b0] sm:$0xff] }
  0x2b   : > { %609 = vmatprep.subr.mxu1 %v371_v45  ;;  %533 = vmatpush1.msra.mxu0 %v210_v46  ;;  %v336_v8 = vld [vmem:[%s2746_s1 + $0x490] sm:$0xff]  ;;  %v335_v10 = vld [vmem:[%s2746_s1 + $0x488] sm:$0xff]  ;;  %v330_v14 = vld [vmem:[%s2746_s1 + $0x460] sm:$0xff] }
  0x2c   : > { %610 = vmatpush1.msra.mxu1 %v370_v47  ;;  %534 = vmatprep.subr.mxu0 %v206_v48  ;;  %v496_v9 = vld [vmem:[%s2746_s1 + $0x990] sm:$0xff]  ;;  %v495_v11 = vld [vmem:[%s2746_s1 + $0x988] sm:$0xff]  ;;  %v490_v15 = vld [vmem:[%s2746_s1 + $0x960] sm:$0xff] }
  0x2d   : > { %611 = vmatprep.subr.mxu1 %v366_v49  ;;  %535 = vmatpush1.msra.mxu0 %v205_v50  ;;  %v331_v12 = vld [vmem:[%s2746_s1 + $0x468] sm:$0xff]  ;;  %v326_v16 = vld [vmem:[%s2746_s1 + $0x440] sm:$0xff]  ;;  %v325_v18 = vld [vmem:[%s2746_s1 + $0x438] sm:$0xff] }
  0x2e   : > { %612 = vmatpush1.msra.mxu1 %v365_v51  ;;  %536 = vmatprep.subr.mxu0 %v201_v52  ;;  %v491_v13 = vld [vmem:[%s2746_s1 + $0x968] sm:$0xff]  ;;  %v486_v17 = vld [vmem:[%s2746_s1 + $0x940] sm:$0xff]  ;;  %v485_v19 = vld [vmem:[%s2746_s1 + $0x938] sm:$0xff] }
  0x2f   : > { %613 = vmatprep.subr.mxu1 %v361_v53  ;;  %537 = vmatpush1.msra.mxu0 %v200_v54  ;;  %v321_v20 = vld [vmem:[%s2746_s1 + $0x418] sm:$0xff]  ;;  %v320_v22 = vld [vmem:[%s2746_s1 + $0x410] sm:$0xff]  ;;  %v315_v26 = vld [vmem:[%s2746_s1 + $0x3e8] sm:$0xff] }
  0x30   : > { %614 = vmatpush1.msra.mxu1 %v360_v55  ;;  %538 = vmatprep.subr.mxu0 %v196_v56  ;;  %v481_v21 = vld [vmem:[%s2746_s1 + $0x918] sm:$0xff]  ;;  %v480_v23 = vld [vmem:[%s2746_s1 + $0x910] sm:$0xff]  ;;  %v475_v27 = vld [vmem:[%s2746_s1 + $0x8e8] sm:$0xff] }
  0x31   : > { %615 = vmatprep.subr.mxu1 %v356_v57  ;;  %539 = vmatpush1.msra.mxu0 %v195_v58  ;;  %v316_v24 = vld [vmem:[%s2746_s1 + $0x3f0] sm:$0xff]  ;;  %v311_v28 = vld [vmem:[%s2746_s1 + $0x3c8] sm:$0xff]  ;;  %v310_v30 = vld [vmem:[%s2746_s1 + $0x3c0] sm:$0xff] }
  0x32   : > { %616 = vmatpush1.msra.mxu1 %v355_v59  ;;  %540 = vmatprep.subr.mxu0 %v191_v60  ;;  %v476_v25 = vld [vmem:[%s2746_s1 + $0x8f0] sm:$0xff]  ;;  %v471_v29 = vld [vmem:[%s2746_s1 + $0x8c8] sm:$0xff]  ;;  %v470_v31 = vld [vmem:[%s2746_s1 + $0x8c0] sm:$0xff] }
  0x33   : > { %617 = vmatprep.subr.mxu1 %v351_v61  ;;  %541 = vmatpush1.msra.mxu0 %v190_v62  ;;  %v306_v32 = vld [vmem:[%s2746_s1 + $0x3a0] sm:$0xff]  ;;  %v305_v34 = vld [vmem:[%s2746_s1 + $0x398] sm:$0xff]  ;;  %v300_v38 = vld [vmem:[%s2746_s1 + $0x370] sm:$0xff] }
  0x34   : > { %618 = vmatpush1.msra.mxu1 %v350_v63  ;;  %542 = vmatprep.subr.mxu0 %v346_v0  ;;  %v466_v33 = vld [vmem:[%s2746_s1 + $0x8a0] sm:$0xff]  ;;  %v465_v35 = vld [vmem:[%s2746_s1 + $0x898] sm:$0xff]  ;;  %v460_v39 = vld [vmem:[%s2746_s1 + $0x870] sm:$0xff] }
  0x35   : > { %619 = vmatprep.subr.mxu1 %v506_v1  ;;  %543 = vmatpush2.msra.mxu0 %v345_v2  ;;  %v301_v36 = vld [vmem:[%s2746_s1 + $0x378] sm:$0xff]  ;;  %v296_v40 = vld [vmem:[%s2746_s1 + $0x350] sm:$0xff]  ;;  %v295_v42 = vld [vmem:[%s2746_s1 + $0x348] sm:$0xff] }
  0x36   : > { %620 = vmatpush2.msra.mxu1 %v505_v3  ;;  %544 = vmatprep.subr.mxu0 %v341_v4  ;;  %v461_v37 = vld [vmem:[%s2746_s1 + $0x878] sm:$0xff]  ;;  %v456_v41 = vld [vmem:[%s2746_s1 + $0x850] sm:$0xff]  ;;  %v455_v43 = vld [vmem:[%s2746_s1 + $0x848] sm:$0xff] }
  0x37   : > { %621 = vmatprep.subr.mxu1 %v501_v5  ;;  %545 = vmatpush2.msra.mxu0 %v340_v6  ;;  %v291_v44 = vld [vmem:[%s2746_s1 + $0x328] sm:$0xff]  ;;  %v290_v46 = vld [vmem:[%s2746_s1 + $0x320] sm:$0xff]  ;;  %v285_v50 = vld [vmem:[%s2746_s1 + $0x2f8] sm:$0xff] }
  0x38   : > { %622 = vmatpush2.msra.mxu1 %v500_v7  ;;  %546 = vmatprep.subr.mxu0 %v336_v8  ;;  %v451_v45 = vld [vmem:[%s2746_s1 + $0x828] sm:$0xff]  ;;  %v450_v47 = vld [vmem:[%s2746_s1 + $0x820] sm:$0xff]  ;;  %v445_v51 = vld [vmem:[%s2746_s1 + $0x7f8] sm:$0xff] }
  0x39   : > { %623 = vmatprep.subr.mxu1 %v496_v9  ;;  %547 = vmatpush2.msra.mxu0 %v335_v10  ;;  %v286_v48 = vld [vmem:[%s2746_s1 + $0x300] sm:$0xff]  ;;  %v281_v52 = vld [vmem:[%s2746_s1 + $0x2d8] sm:$0xff]  ;;  %v280_v54 = vld [vmem:[%s2746_s1 + $0x2d0] sm:$0xff] }
  0x3a   : > { %624 = vmatpush2.msra.mxu1 %v495_v11  ;;  %548 = vmatprep.subr.mxu0 %v331_v12  ;;  %v446_v49 = vld [vmem:[%s2746_s1 + $0x800] sm:$0xff]  ;;  %v441_v53 = vld [vmem:[%s2746_s1 + $0x7d8] sm:$0xff]  ;;  %v440_v55 = vld [vmem:[%s2746_s1 + $0x7d0] sm:$0xff] }
  0x3b   : > { %625 = vmatprep.subr.mxu1 %v491_v13  ;;  %549 = vmatpush2.msra.mxu0 %v330_v14  ;;  %v276_v56 = vld [vmem:[%s2746_s1 + $0x2b0] sm:$0xff]  ;;  %v275_v58 = vld [vmem:[%s2746_s1 + $0x2a8] sm:$0xff]  ;;  %v270_v62 = vld [vmem:[%s2746_s1 + $0x280] sm:$0xff] }
  0x3c   : > { %626 = vmatpush2.msra.mxu1 %v490_v15  ;;  %550 = vmatprep.subr.mxu0 %v326_v16  ;;  %v436_v57 = vld [vmem:[%s2746_s1 + $0x7b0] sm:$0xff]  ;;  %v435_v59 = vld [vmem:[%s2746_s1 + $0x7a8] sm:$0xff]  ;;  %v430_v0 = vld [vmem:[%s2746_s1 + $0x780] sm:$0xff] }
  0x3d   : > { %627 = vmatprep.subr.mxu1 %v486_v17  ;;  %551 = vmatpush2.msra.mxu0 %v325_v18  ;;  %v271_v60 = vld [vmem:[%s2746_s1 + $0x288] sm:$0xff]  ;;  %v2016_v2 = vld [vmem:[%s1989_s18] sm:$0xff]  ;;  %v268_v4 = vld [vmem:[%s2746_s1 + $0x270] sm:$0xff] }
  0x3e   : > { %628 = vmatpush2.msra.mxu1 %v485_v19  ;;  %552 = vmatprep.subr.mxu0 %v321_v20  ;;  %v431_v61 = vld [vmem:[%s2746_s1 + $0x788] sm:$0xff]  ;;  %v428_v5 = vld [vmem:[%s2746_s1 + $0x770] sm:$0xff]  ;;  %v262_v10 = vld [vmem:[%s2746_s1 + $0x240] sm:$0xff] }
  0x3f   : > { %629 = vmatprep.subr.mxu1 %v481_v21  ;;  %553 = vmatpush2.msra.mxu0 %v320_v22  ;;  %v2007_v63 = vld [vmem:[%s1989_s18 + $0x1] sm:$0xff]  ;;  %v257_v14 = vld [vmem:[%s2746_s1 + $0x218] sm:$0xff]  ;;  %v252_v18 = vld [vmem:[%s2746_s1 + $0x1f0] sm:$0xff] }
  0x40   : > { %630 = vmatpush2.msra.mxu1 %v480_v23  ;;  %554 = vmatprep.subr.mxu0 %v316_v24  ;;  %v2013_v1 = vld [vmem:[%s1989_s18 + $0x3] sm:$0xff]  ;;  %v417_v15 = vld [vmem:[%s2746_s1 + $0x718] sm:$0xff]  ;;  %v412_v19 = vld [vmem:[%s2746_s1 + $0x6f0] sm:$0xff] }
  0x41   : > { %631 = vmatprep.subr.mxu1 %v476_v25  ;;  %555 = vmatpush2.msra.mxu0 %v315_v26  ;;  %v2019_v3 = vld [vmem:[%s1989_s18 + $0x2] sm:$0xff]  ;;  %v253_v16 = vld [vmem:[%s2746_s1 + $0x1f8] sm:$0xff]  ;;  %v248_v20 = vld [vmem:[%s2746_s1 + $0x1d0] sm:$0xff] }
  0x42   : > { %632 = vmatpush2.msra.mxu1 %v475_v27  ;;  %556 = vmatprep.subr.mxu0 %v311_v28  ;;  %v267_v6 = vld [vmem:[%s2746_s1 + $0x268] sm:$0xff]  ;;  %v422_v11 = vld [vmem:[%s2746_s1 + $0x740] sm:$0xff]  ;;  %v413_v17 = vld [vmem:[%s2746_s1 + $0x6f8] sm:$0xff] }
  0x43   : > { %633 = vmatprep.subr.mxu1 %v471_v29  ;;  %557 = vmatpush2.msra.mxu0 %v310_v30  ;;  %v427_v7 = vld [vmem:[%s2746_s1 + $0x768] sm:$0xff]  ;;  %v258_v12 = vld [vmem:[%s2746_s1 + $0x220] sm:$0xff]  ;;  %v408_v21 = vld [vmem:[%s2746_s1 + $0x6d0] sm:$0xff] }
  0x44   : > { %634 = vmatpush2.msra.mxu1 %v470_v31  ;;  %558 = vmatprep.subr.mxu0 %v306_v32  ;;  %v263_v8 = vld [vmem:[%s2746_s1 + $0x248] sm:$0xff]  ;;  %v418_v13 = vld [vmem:[%s2746_s1 + $0x720] sm:$0xff]  ;;  %v237_v30 = vld [vmem:[%s2746_s1 + $0x178] sm:$0xff] }
  0x45   : > { %635 = vmatprep.subr.mxu1 %v466_v33  ;;  %559 = vmatpush2.msra.mxu0 %v305_v34  ;;  %v423_v9 = vld [vmem:[%s2746_s1 + $0x748] sm:$0xff]  ;;  %v242_v26 = vld [vmem:[%s2746_s1 + $0x1a0] sm:$0xff]  ;;  %v397_v31 = vld [vmem:[%s2746_s1 + $0x678] sm:$0xff] }
  0x46   : > { %636 = vmatpush2.msra.mxu1 %v465_v35  ;;  %560 = vmatprep.subr.mxu0 %v301_v36  ;;  %v247_v22 = vld [vmem:[%s2746_s1 + $0x1c8] sm:$0xff]  ;;  %v402_v27 = vld [vmem:[%s2746_s1 + $0x6a0] sm:$0xff]  ;;  %v233_v32 = vld [vmem:[%s2746_s1 + $0x158] sm:$0xff] }
  0x47   : > { %637 = vmatprep.subr.mxu1 %v461_v37  ;;  %561 = vmatpush2.msra.mxu0 %v300_v38  ;;  %v407_v23 = vld [vmem:[%s2746_s1 + $0x6c8] sm:$0xff]  ;;  %v238_v28 = vld [vmem:[%s2746_s1 + $0x180] sm:$0xff]  ;;  %v393_v33 = vld [vmem:[%s2746_s1 + $0x658] sm:$0xff] }
  0x48   : > { %638 = vmatpush2.msra.mxu1 %v460_v39  ;;  %562 = vmatprep.subr.mxu0 %v296_v40  ;;  %v243_v24 = vld [vmem:[%s2746_s1 + $0x1a8] sm:$0xff]  ;;  %v398_v29 = vld [vmem:[%s2746_s1 + $0x680] sm:$0xff]  ;;  %v232_v34 = vld [vmem:[%s2746_s1 + $0x150] sm:$0xff] }
  0x49   : > { %639 = vmatprep.subr.mxu1 %v456_v41  ;;  %563 = vmatpush2.msra.mxu0 %v295_v42  ;;  %v403_v25 = vld [vmem:[%s2746_s1 + $0x6a8] sm:$0xff]  ;;  %v392_v35 = vld [vmem:[%s2746_s1 + $0x650] sm:$0xff]  ;;  %v222_v42 = vld [vmem:[%s2746_s1 + $0x100] sm:$0xff] }
  0x4a   : > { %640 = vmatpush2.msra.mxu1 %v455_v43  ;;  %564 = vmatprep.subr.mxu0 %v291_v44  ;;  %v228_v36 = vld [vmem:[%s2746_s1 + $0x130] sm:$0xff]  ;;  %v227_v38 = vld [vmem:[%s2746_s1 + $0x128] sm:$0xff]  ;;  %v382_v43 = vld [vmem:[%s2746_s1 + $0x600] sm:$0xff] }
  0x4b   : > { %641 = vmatprep.subr.mxu1 %v451_v45  ;;  %565 = vmatpush2.msra.mxu0 %v290_v46  ;;  %v388_v37 = vld [vmem:[%s2746_s1 + $0x630] sm:$0xff]  ;;  %v387_v39 = vld [vmem:[%s2746_s1 + $0x628] sm:$0xff]  ;;  %v218_v44 = vld [vmem:[%s2746_s1 + $0xe0] sm:$0xff] }
  0x4c   : > { %642 = vmatpush2.msra.mxu1 %v450_v47  ;;  %566 = vmatprep.subr.mxu0 %v286_v48  ;;  %v223_v40 = vld [vmem:[%s2746_s1 + $0x108] sm:$0xff]  ;;  %v378_v45 = vld [vmem:[%s2746_s1 + $0x5e0] sm:$0xff]  ;;  %v217_v46 = vld [vmem:[%s2746_s1 + $0xd8] sm:$0xff] }
  0x4d   : > { %643 = vmatprep.subr.mxu1 %v446_v49  ;;  %567 = vmatpush2.msra.mxu0 %v285_v50  ;;  %v383_v41 = vld [vmem:[%s2746_s1 + $0x608] sm:$0xff]  ;;  %v377_v47 = vld [vmem:[%s2746_s1 + $0x5d8] sm:$0xff]  ;;  %v212_v50 = vld [vmem:[%s2746_s1 + $0xb0] sm:$0xff] }
  0x4e   : > { %644 = vmatpush2.msra.mxu1 %v445_v51  ;;  %568 = vmatprep.subr.mxu0 %v281_v52  ;;  %v213_v48 = vld [vmem:[%s2746_s1 + $0xb8] sm:$0xff]  ;;  %v372_v51 = vld [vmem:[%s2746_s1 + $0x5b0] sm:$0xff] }
  0x4f   : > { %645 = vmatprep.subr.mxu1 %v441_v53  ;;  %569 = vmatpush2.msra.mxu0 %v280_v54  ;;  %v373_v49 = vld [vmem:[%s2746_s1 + $0x5b8] sm:$0xff]  ;;  %v208_v52 = vld [vmem:[%s2746_s1 + $0x90] sm:$0xff]  ;;  %v207_v54 = vld [vmem:[%s2746_s1 + $0x88] sm:$0xff] }
  0x50   : > { %646 = vmatpush2.msra.mxu1 %v440_v55  ;;  %570 = vmatprep.subr.mxu0 %v276_v56  ;;  %v368_v53 = vld [vmem:[%s2746_s1 + $0x590] sm:$0xff]  ;;  %v367_v55 = vld [vmem:[%s2746_s1 + $0x588] sm:$0xff] }
  0x51   : > { %647 = vmatprep.subr.mxu1 %v436_v57  ;;  %571 = vmatpush2.msra.mxu0 %v275_v58  ;;  %v203_v56 = vld [vmem:[%s2746_s1 + $0x68] sm:$0xff]  ;;  %v202_v58 = vld [vmem:[%s2746_s1 + $0x60] sm:$0xff] }
  0x52   : > { %648 = vmatpush2.msra.mxu1 %v435_v59  ;;  %572 = vmatprep.subr.mxu0 %v271_v60  ;;  %v363_v57 = vld [vmem:[%s2746_s1 + $0x568] sm:$0xff]  ;;  %v362_v59 = vld [vmem:[%s2746_s1 + $0x560] sm:$0xff] }
  0x53   : > { %649 = vmatprep.subr.mxu1 %v431_v61  ;;  %573 = vmatpush2.msra.mxu0 %v270_v62  ;;  %v198_v60 = vld [vmem:[%s2746_s1 + $0x40] sm:$0xff]  ;;  %v197_v62 = vld [vmem:[%s2746_s1 + $0x38] sm:$0xff] }
  0x54   : > { %574 = vmatprep.mubr.f32.mxu0 %v2007_v63  ;;  %650 = vmatpush2.msra.mxu1 %v430_v0  ;;  %v358_v61 = vld [vmem:[%s2746_s1 + $0x540] sm:$0xff]  ;;  %v357_v0 = vld [vmem:[%s2746_s1 + $0x538] sm:$0xff] }
  0x55   : > { %651 = vmatprep.mubr.f32.mxu1 %v2013_v1  ;;  %575 = vmatmul.mubr.f32.vlgmr.msra.gmra.mxu0 %v2016_v2 }
  0x56   : > { %652 = vmatmul.mubr.f32.vlgmr.msra.gmra.mxu1 %v2019_v3  ;;  %664 = vmatprep.subr.mxu0 %v268_v4  ;;  %v193_v4 = vld [vmem:[%s2746_s1 + $0x18] sm:$0xff] }
  0x57   : > { %741 = vmatprep.subr.mxu1 %v428_v5  ;;  %665 = vmatpush1.msra.mxu0 %v267_v6  ;;  %v353_v5 = vld [vmem:[%s2746_s1 + $0x518] sm:$0xff]  ;;  %v192_v6 = vld [vmem:[%s2746_s1 + $0x10] sm:$0xff] }
  0x58   : > { %742 = vmatpush1.msra.mxu1 %v427_v7  ;;  %666 = vmatprep.subr.mxu0 %v263_v8  ;;  %v352_v7 = vld [vmem:[%s2746_s1 + $0x510] sm:$0xff] }
  0x59   : > { %743 = vmatprep.subr.mxu1 %v423_v9  ;;  %667 = vmatpush1.msra.mxu0 %v262_v10  ;;  %v348_v8 = vld [vmem:[%s2746_s1 + $0x4f0] sm:$0xff]  ;;  %v347_v10 = vld [vmem:[%s2746_s1 + $0x4e8] sm:$0xff] }
  0x5a   : > { %744 = vmatpush1.msra.mxu1 %v422_v11  ;;  %668 = vmatprep.subr.mxu0 %v258_v12  ;;  %v508_v9 = vld [vmem:[%s2746_s1 + $0x9f0] sm:$0xff]  ;;  %v507_v11 = vld [vmem:[%s2746_s1 + $0x9e8] sm:$0xff] }
  0x5b   : > { %745 = vmatprep.subr.mxu1 %v418_v13  ;;  %669 = vmatpush1.msra.mxu0 %v257_v14  ;;  %v343_v12 = vld [vmem:[%s2746_s1 + $0x4c8] sm:$0xff]  ;;  %v342_v14 = vld [vmem:[%s2746_s1 + $0x4c0] sm:$0xff] }
  0x5c   : > { %746 = vmatpush1.msra.mxu1 %v417_v15  ;;  %670 = vmatprep.subr.mxu0 %v253_v16  ;;  %v503_v13 = vld [vmem:[%s2746_s1 + $0x9c8] sm:$0xff]  ;;  %v502_v15 = vld [vmem:[%s2746_s1 + $0x9c0] sm:$0xff] }
  0x5d   : > { %747 = vmatprep.subr.mxu1 %v413_v17  ;;  %671 = vmatpush1.msra.mxu0 %v252_v18  ;;  %v338_v16 = vld [vmem:[%s2746_s1 + $0x4a0] sm:$0xff]  ;;  %v337_v18 = vld [vmem:[%s2746_s1 + $0x498] sm:$0xff] }
  0x5e   : > { %748 = vmatpush1.msra.mxu1 %v412_v19  ;;  %672 = vmatprep.subr.mxu0 %v248_v20  ;;  %v498_v17 = vld [vmem:[%s2746_s1 + $0x9a0] sm:$0xff]  ;;  %v497_v19 = vld [vmem:[%s2746_s1 + $0x998] sm:$0xff] }
  0x5f   : > { %749 = vmatprep.subr.mxu1 %v408_v21  ;;  %673 = vmatpush1.msra.mxu0 %v247_v22  ;;  %v333_v20 = vld [vmem:[%s2746_s1 + $0x478] sm:$0xff]  ;;  %v332_v22 = vld [vmem:[%s2746_s1 + $0x470] sm:$0xff] }
  0x60   : > { %750 = vmatpush1.msra.mxu1 %v407_v23  ;;  %674 = vmatprep.subr.mxu0 %v243_v24  ;;  %v493_v21 = vld [vmem:[%s2746_s1 + $0x978] sm:$0xff]  ;;  %v492_v23 = vld [vmem:[%s2746_s1 + $0x970] sm:$0xff] }
  0x61   : > { %751 = vmatprep.subr.mxu1 %v403_v25  ;;  %675 = vmatpush1.msra.mxu0 %v242_v26  ;;  %v328_v24 = vld [vmem:[%s2746_s1 + $0x450] sm:$0xff]  ;;  %v327_v26 = vld [vmem:[%s2746_s1 + $0x448] sm:$0xff] }
  0x62   : > { %752 = vmatpush1.msra.mxu1 %v402_v27  ;;  %676 = vmatprep.subr.mxu0 %v238_v28  ;;  %v488_v25 = vld [vmem:[%s2746_s1 + $0x950] sm:$0xff]  ;;  %v487_v27 = vld [vmem:[%s2746_s1 + $0x948] sm:$0xff] }
  0x63   : > { %753 = vmatprep.subr.mxu1 %v398_v29  ;;  %677 = vmatpush1.msra.mxu0 %v237_v30  ;;  %v323_v28 = vld [vmem:[%s2746_s1 + $0x428] sm:$0xff]  ;;  %v322_v30 = vld [vmem:[%s2746_s1 + $0x420] sm:$0xff] }
  0x64   : > { %754 = vmatpush1.msra.mxu1 %v397_v31  ;;  %678 = vmatprep.subr.mxu0 %v233_v32  ;;  %v483_v29 = vld [vmem:[%s2746_s1 + $0x928] sm:$0xff]  ;;  %v482_v31 = vld [vmem:[%s2746_s1 + $0x920] sm:$0xff] }
  0x65   : > { %755 = vmatprep.subr.mxu1 %v393_v33  ;;  %679 = vmatpush1.msra.mxu0 %v232_v34  ;;  %v318_v32 = vld [vmem:[%s2746_s1 + $0x400] sm:$0xff]  ;;  %v317_v34 = vld [vmem:[%s2746_s1 + $0x3f8] sm:$0xff] }
  0x66   : > { %756 = vmatpush1.msra.mxu1 %v392_v35  ;;  %680 = vmatprep.subr.mxu0 %v228_v36  ;;  %v478_v33 = vld [vmem:[%s2746_s1 + $0x900] sm:$0xff]  ;;  %v477_v35 = vld [vmem:[%s2746_s1 + $0x8f8] sm:$0xff] }
  0x67   : > { %757 = vmatprep.subr.mxu1 %v388_v37  ;;  %681 = vmatpush1.msra.mxu0 %v227_v38  ;;  %v313_v36 = vld [vmem:[%s2746_s1 + $0x3d8] sm:$0xff]  ;;  %v312_v38 = vld [vmem:[%s2746_s1 + $0x3d0] sm:$0xff] }
  0x68   : > { %758 = vmatpush1.msra.mxu1 %v387_v39  ;;  %682 = vmatprep.subr.mxu0 %v223_v40  ;;  %v473_v37 = vld [vmem:[%s2746_s1 + $0x8d8] sm:$0xff]  ;;  %v472_v39 = vld [vmem:[%s2746_s1 + $0x8d0] sm:$0xff] }
  0x69   : > { %759 = vmatprep.subr.mxu1 %v383_v41  ;;  %683 = vmatpush1.msra.mxu0 %v222_v42  ;;  %v308_v40 = vld [vmem:[%s2746_s1 + $0x3b0] sm:$0xff]  ;;  %v307_v42 = vld [vmem:[%s2746_s1 + $0x3a8] sm:$0xff] }
  0x6a   : > { %760 = vmatpush1.msra.mxu1 %v382_v43  ;;  %684 = vmatprep.subr.mxu0 %v218_v44  ;;  %v468_v41 = vld [vmem:[%s2746_s1 + $0x8b0] sm:$0xff]  ;;  %v467_v43 = vld [vmem:[%s2746_s1 + $0x8a8] sm:$0xff] }
  0x6b   : > { %761 = vmatprep.subr.mxu1 %v378_v45  ;;  %685 = vmatpush1.msra.mxu0 %v217_v46  ;;  %v303_v44 = vld [vmem:[%s2746_s1 + $0x388] sm:$0xff]  ;;  %v302_v46 = vld [vmem:[%s2746_s1 + $0x380] sm:$0xff] }
  0x6c   : > { %762 = vmatpush1.msra.mxu1 %v377_v47  ;;  %686 = vmatprep.subr.mxu0 %v213_v48  ;;  %v463_v45 = vld [vmem:[%s2746_s1 + $0x888] sm:$0xff]  ;;  %v462_v47 = vld [vmem:[%s2746_s1 + $0x880] sm:$0xff] }
  0x6d   : > { %763 = vmatprep.subr.mxu1 %v373_v49  ;;  %687 = vmatpush1.msra.mxu0 %v212_v50  ;;  %v298_v48 = vld [vmem:[%s2746_s1 + $0x360] sm:$0xff]  ;;  %v297_v50 = vld [vmem:[%s2746_s1 + $0x358] sm:$0xff] }
  0x6e   : > { %764 = vmatpush1.msra.mxu1 %v372_v51  ;;  %688 = vmatprep.subr.mxu0 %v208_v52  ;;  %v458_v49 = vld [vmem:[%s2746_s1 + $0x860] sm:$0xff]  ;;  %v457_v51 = vld [vmem:[%s2746_s1 + $0x858] sm:$0xff] }
  0x6f   : > { %765 = vmatprep.subr.mxu1 %v368_v53  ;;  %689 = vmatpush1.msra.mxu0 %v207_v54  ;;  %v293_v52 = vld [vmem:[%s2746_s1 + $0x338] sm:$0xff]  ;;  %v292_v54 = vld [vmem:[%s2746_s1 + $0x330] sm:$0xff] }
  0x70   : > { %766 = vmatpush1.msra.mxu1 %v367_v55  ;;  %690 = vmatprep.subr.mxu0 %v203_v56  ;;  %v453_v53 = vld [vmem:[%s2746_s1 + $0x838] sm:$0xff]  ;;  %v452_v55 = vld [vmem:[%s2746_s1 + $0x830] sm:$0xff] }
  0x71   : > { %767 = vmatprep.subr.mxu1 %v363_v57  ;;  %691 = vmatpush1.msra.mxu0 %v202_v58  ;;  %v288_v56 = vld [vmem:[%s2746_s1 + $0x310] sm:$0xff]  ;;  %v287_v58 = vld [vmem:[%s2746_s1 + $0x308] sm:$0xff] }
  0x72   : > { %768 = vmatpush1.msra.mxu1 %v362_v59  ;;  %692 = vmatprep.subr.mxu0 %v198_v60  ;;  %v448_v57 = vld [vmem:[%s2746_s1 + $0x810] sm:$0xff]  ;;  %v447_v59 = vld [vmem:[%s2746_s1 + $0x808] sm:$0xff] }
  0x73   : > { %769 = vmatprep.subr.mxu1 %v358_v61  ;;  %693 = vmatpush1.msra.mxu0 %v197_v62  ;;  %v2374_v60 = vld [vmem:[%s1989_s18 + $0x9] sm:$0xff] }
  0x74   : > { %770 = vmatpush1.msra.mxu1 %v357_v0  ;;  %694 = vmatprep.subr.mxu0 %v193_v4  ;;  %v2377_v61 = vld [vmem:[%s1989_s18 + $0xb] sm:$0xff] }
  0x75   : > { %771 = vmatprep.subr.mxu1 %v353_v5  ;;  %695 = vmatpush1.msra.mxu0 %v192_v6  ;;  %v283_v62 = vld [vmem:[%s2746_s1 + $0x2e8] sm:$0xff]  ;;  %v282_v6 = vld [vmem:[%s2746_s1 + $0x2e0] sm:$0xff] }
  0x76   : > { %772 = vmatpush1.msra.mxu1 %v352_v7  ;;  %696 = vmatprep.subr.mxu0 %v348_v8  ;;  %v443_v0 = vld [vmem:[%s2746_s1 + $0x7e8] sm:$0xff]  ;;  %v442_v7 = vld [vmem:[%s2746_s1 + $0x7e0] sm:$0xff] }
  0x77   : > { %773 = vmatprep.subr.mxu1 %v508_v9  ;;  %697 = vmatpush2.msra.mxu0 %v347_v10  ;;  %v2386_v4 = vld [vmem:[%s1989_s18 + $0x8] sm:$0xff]  ;;  %v278_v8 = vld [vmem:[%s2746_s1 + $0x2c0] sm:$0xff]  ;;  %v277_v10 = vld [vmem:[%s2746_s1 + $0x2b8] sm:$0xff] }
  0x78   : > { %774 = vmatpush2.msra.mxu1 %v507_v11  ;;  %698 = vmatprep.subr.mxu0 %v343_v12  ;;  %v2389_v5 = vld [vmem:[%s1989_s18 + $0xa] sm:$0xff]  ;;  %v438_v9 = vld [vmem:[%s2746_s1 + $0x7c0] sm:$0xff]  ;;  %v437_v11 = vld [vmem:[%s2746_s1 + $0x7b8] sm:$0xff]  ;;  %s2657_s18 = scalar_lea.vmem (%p1599_p5), %s2747_s2, %s1209_s4  }
  0x79   : > { %775 = vmatprep.subr.mxu1 %v503_v13  ;;  %699 = vmatpush2.msra.mxu0 %v342_v14  ;;  %v273_v12 = vld [vmem:[%s2746_s1 + $0x298] sm:$0xff]  ;;  %v272_v14 = vld [vmem:[%s2746_s1 + $0x290] sm:$0xff] }
  0x7a   : > { %776 = vmatpush2.msra.mxu1 %v502_v15  ;;  %700 = vmatprep.subr.mxu0 %v338_v16  ;;  %v433_v13 = vld [vmem:[%s2746_s1 + $0x798] sm:$0xff]  ;;  %v432_v15 = vld [vmem:[%s2746_s1 + $0x790] sm:$0xff] }
  0x7b   : > { %777 = vmatprep.subr.mxu1 %v498_v17  ;;  %701 = vmatpush2.msra.mxu0 %v337_v18  ;;  %v349_v16 = vld [vmem:[%s2746_s1 + $0x4f8] sm:$0xff] }
  0x7c   : > { %778 = vmatpush2.msra.mxu1 %v497_v19  ;;  %702 = vmatprep.subr.mxu0 %v333_v20  ;;  %v509_v17 = vld [vmem:[%s2746_s1 + $0x9f8] sm:$0xff]  ;;  %v344_v20 = vld [vmem:[%s2746_s1 + $0x4d0] sm:$0xff] }
  0x7d   : > { %779 = vmatprep.subr.mxu1 %v493_v21  ;;  %703 = vmatpush2.msra.mxu0 %v332_v22  ;;  %v269_v18 = vld [vmem:[%s2746_s1 + $0x278] sm:$0xff]  ;;  %v504_v21 = vld [vmem:[%s2746_s1 + $0x9d0] sm:$0xff] }
  0x7e   : > { %780 = vmatpush2.msra.mxu1 %v492_v23  ;;  %704 = vmatprep.subr.mxu0 %v328_v24  ;;  %v429_v19 = vld [vmem:[%s2746_s1 + $0x778] sm:$0xff]  ;;  %v264_v22 = vld [vmem:[%s2746_s1 + $0x250] sm:$0xff]  ;;  %v339_v24 = vld [vmem:[%s2746_s1 + $0x4a8] sm:$0xff] }
  0x7f   : > { %781 = vmatprep.subr.mxu1 %v488_v25  ;;  %705 = vmatpush2.msra.mxu0 %v327_v26  ;;  %v424_v23 = vld [vmem:[%s2746_s1 + $0x750] sm:$0xff]  ;;  %v499_v25 = vld [vmem:[%s2746_s1 + $0x9a8] sm:$0xff] }
  0x80   : > { %782 = vmatpush2.msra.mxu1 %v487_v27  ;;  %706 = vmatprep.subr.mxu0 %v323_v28  ;;  %v259_v26 = vld [vmem:[%s2746_s1 + $0x228] sm:$0xff]  ;;  %v334_v28 = vld [vmem:[%s2746_s1 + $0x480] sm:$0xff] }
  0x81   : > { %783 = vmatprep.subr.mxu1 %v483_v29  ;;  %707 = vmatpush2.msra.mxu0 %v322_v30  ;;  %v419_v27 = vld [vmem:[%s2746_s1 + $0x728] sm:$0xff]  ;;  %v494_v29 = vld [vmem:[%s2746_s1 + $0x980] sm:$0xff] }
  0x82   : > { %784 = vmatpush2.msra.mxu1 %v482_v31  ;;  %708 = vmatprep.subr.mxu0 %v318_v32  ;;  %v254_v30 = vld [vmem:[%s2746_s1 + $0x200] sm:$0xff]  ;;  %v329_v32 = vld [vmem:[%s2746_s1 + $0x458] sm:$0xff] }
  0x83   : > { %785 = vmatprep.subr.mxu1 %v478_v33  ;;  %709 = vmatpush2.msra.mxu0 %v317_v34  ;;  %v414_v31 = vld [vmem:[%s2746_s1 + $0x700] sm:$0xff]  ;;  %v489_v33 = vld [vmem:[%s2746_s1 + $0x958] sm:$0xff] }
  0x84   : > { %786 = vmatpush2.msra.mxu1 %v477_v35  ;;  %710 = vmatprep.subr.mxu0 %v313_v36  ;;  %v249_v34 = vld [vmem:[%s2746_s1 + $0x1d8] sm:$0xff]  ;;  %v324_v36 = vld [vmem:[%s2746_s1 + $0x430] sm:$0xff] }
  0x85   : > { %787 = vmatprep.subr.mxu1 %v473_v37  ;;  %711 = vmatpush2.msra.mxu0 %v312_v38  ;;  %v409_v35 = vld [vmem:[%s2746_s1 + $0x6d8] sm:$0xff]  ;;  %v484_v37 = vld [vmem:[%s2746_s1 + $0x930] sm:$0xff] }
  0x86   : > { %788 = vmatpush2.msra.mxu1 %v472_v39  ;;  %712 = vmatprep.subr.mxu0 %v308_v40  ;;  %v244_v38 = vld [vmem:[%s2746_s1 + $0x1b0] sm:$0xff]  ;;  %v319_v40 = vld [vmem:[%s2746_s1 + $0x408] sm:$0xff] }
  0x87   : > { %789 = vmatprep.subr.mxu1 %v468_v41  ;;  %713 = vmatpush2.msra.mxu0 %v307_v42  ;;  %v404_v39 = vld [vmem:[%s2746_s1 + $0x6b0] sm:$0xff]  ;;  %v479_v41 = vld [vmem:[%s2746_s1 + $0x908] sm:$0xff] }
  0x88   : > { %790 = vmatpush2.msra.mxu1 %v467_v43  ;;  %714 = vmatprep.subr.mxu0 %v303_v44  ;;  %v239_v42 = vld [vmem:[%s2746_s1 + $0x188] sm:$0xff]  ;;  %v314_v44 = vld [vmem:[%s2746_s1 + $0x3e0] sm:$0xff] }
  0x89   : > { %791 = vmatprep.subr.mxu1 %v463_v45  ;;  %715 = vmatpush2.msra.mxu0 %v302_v46  ;;  %v399_v43 = vld [vmem:[%s2746_s1 + $0x688] sm:$0xff]  ;;  %v474_v45 = vld [vmem:[%s2746_s1 + $0x8e0] sm:$0xff] }
  0x8a   : > { %792 = vmatpush2.msra.mxu1 %v462_v47  ;;  %716 = vmatprep.subr.mxu0 %v298_v48  ;;  %v234_v46 = vld [vmem:[%s2746_s1 + $0x160] sm:$0xff]  ;;  %v309_v48 = vld [vmem:[%s2746_s1 + $0x3b8] sm:$0xff] }
  0x8b   : > { %793 = vmatprep.subr.mxu1 %v458_v49  ;;  %717 = vmatpush2.msra.mxu0 %v297_v50  ;;  %v394_v47 = vld [vmem:[%s2746_s1 + $0x660] sm:$0xff]  ;;  %v469_v49 = vld [vmem:[%s2746_s1 + $0x8b8] sm:$0xff] }
  0x8c   : > { %794 = vmatpush2.msra.mxu1 %v457_v51  ;;  %718 = vmatprep.subr.mxu0 %v293_v52  ;;  %v229_v50 = vld [vmem:[%s2746_s1 + $0x138] sm:$0xff]  ;;  %v304_v52 = vld [vmem:[%s2746_s1 + $0x390] sm:$0xff] }
  0x8d   : > { %795 = vmatprep.subr.mxu1 %v453_v53  ;;  %719 = vmatpush2.msra.mxu0 %v292_v54  ;;  %v389_v51 = vld [vmem:[%s2746_s1 + $0x638] sm:$0xff]  ;;  %v464_v53 = vld [vmem:[%s2746_s1 + $0x890] sm:$0xff] }
  0x8e   : > { %796 = vmatpush2.msra.mxu1 %v452_v55  ;;  %720 = vmatprep.subr.mxu0 %v288_v56  ;;  %v224_v54 = vld [vmem:[%s2746_s1 + $0x110] sm:$0xff]  ;;  %v299_v56 = vld [vmem:[%s2746_s1 + $0x368] sm:$0xff] }
  0x8f   : > { %797 = vmatprep.subr.mxu1 %v448_v57  ;;  %721 = vmatpush2.msra.mxu0 %v287_v58  ;;  %v384_v55 = vld [vmem:[%s2746_s1 + $0x610] sm:$0xff]  ;;  %v459_v57 = vld [vmem:[%s2746_s1 + $0x868] sm:$0xff] }
  0x90   : > { %798 = vmatpush2.msra.mxu1 %v447_v59  ;;  %580 = vmatprep.mubr.f32.mxu0 %v2374_v60  ;;  %v219_v58 = vld [vmem:[%s2746_s1 + $0xe8] sm:$0xff] }
  0x91   : > { %657 = vmatprep.mubr.f32.mxu1 %v2377_v61  ;;  %722 = vmatprep.subr.mxu0 %v283_v62  ;;  %v379_v59 = vld [vmem:[%s2746_s1 + $0x5e8] sm:$0xff]  ;;  %v294_v62 = vld [vmem:[%s2746_s1 + $0x340] sm:$0xff] }
  0x92   : > { %799 = vmatprep.subr.mxu1 %v443_v0  ;;  %581 = vmatmul.mubr.f32.gmra.mxu0 %v2386_v4  ;;  %v454_v0 = vld [vmem:[%s2746_s1 + $0x840] sm:$0xff] }
  0x93   : > { %658 = vmatmul.mubr.f32.gmra.mxu1 %v2389_v5  ;;  %723 = vmatpush2.msra.mxu0 %v282_v6  ;;  %v214_v6 = vld [vmem:[%s2746_s1 + $0xc0] sm:$0xff] }
  0x94   : > { %800 = vmatpush2.msra.mxu1 %v442_v7  ;;  %724 = vmatprep.subr.mxu0 %v278_v8  ;;  %v374_v7 = vld [vmem:[%s2746_s1 + $0x5c0] sm:$0xff]  ;;  %v289_v8 = vld [vmem:[%s2746_s1 + $0x318] sm:$0xff] }
  0x95   : > { %801 = vmatprep.subr.mxu1 %v438_v9  ;;  %725 = vmatpush2.msra.mxu0 %v277_v10  ;;  %v449_v9 = vld [vmem:[%s2746_s1 + $0x818] sm:$0xff] }
  0x96   : > { %802 = vmatpush2.msra.mxu1 %v437_v11  ;;  %726 = vmatprep.subr.mxu0 %v273_v12  ;;  %v209_v10 = vld [vmem:[%s2746_s1 + $0x98] sm:$0xff]  ;;  %v284_v12 = vld [vmem:[%s2746_s1 + $0x2f0] sm:$0xff] }
  0x97   : > { %803 = vmatprep.subr.mxu1 %v433_v13  ;;  %727 = vmatpush2.msra.mxu0 %v272_v14  ;;  %v369_v11 = vld [vmem:[%s2746_s1 + $0x598] sm:$0xff]  ;;  %v444_v13 = vld [vmem:[%s2746_s1 + $0x7f0] sm:$0xff] }
  0x98   : > { %728 = vmatprep.mubr.f32.mxu0 %v2007_v63  ;;  %804 = vmatpush2.msra.mxu1 %v432_v15  ;;  %v204_v14 = vld [vmem:[%s2746_s1 + $0x70] sm:$0xff] }
  0x99   : > { %805 = vmatprep.mubr.f32.mxu1 %v2013_v1  ;;  %729 = vmatmul.mubr.f32.vlgmr.msra.gmra.mxu0 %v2016_v2  ;;  %v364_v15 = vld [vmem:[%s2746_s1 + $0x570] sm:$0xff] }
  0x9a   : > { %806 = vmatmul.mubr.f32.vlgmr.msra.gmra.mxu1 %v2019_v3  ;;  %1218 = vmatprep.subr.mxu0 %v349_v16  ;;  %v279_v16 = vld [vmem:[%s2746_s1 + $0x2c8] sm:$0xff] }
  0x9b   : > { %1256 = vmatprep.subr.mxu1 %v509_v17  ;;  %1219 = vmatpush3.msra.mxu0 %v269_v18  ;;  %v439_v17 = vld [vmem:[%s2746_s1 + $0x7c8] sm:$0xff] }
  0x9c   : > { %1257 = vmatpush3.msra.mxu1 %v429_v19  ;;  %1220 = vmatprep.subr.mxu0 %v344_v20  ;;  %v199_v18 = vld [vmem:[%s2746_s1 + $0x48] sm:$0xff]  ;;  %v274_v20 = vld [vmem:[%s2746_s1 + $0x2a0] sm:$0xff] }
  0x9d   : > { %1258 = vmatprep.subr.mxu1 %v504_v21  ;;  %1221 = vmatpush3.msra.mxu0 %v264_v22  ;;  %v359_v19 = vld [vmem:[%s2746_s1 + $0x548] sm:$0xff]  ;;  %v434_v21 = vld [vmem:[%s2746_s1 + $0x7a0] sm:$0xff] }
  0x9e   : > { %1259 = vmatpush3.msra.mxu1 %v424_v23  ;;  %1222 = vmatprep.subr.mxu0 %v339_v24  ;;  %v194_v22 = vld [vmem:[%s2746_s1 + $0x20] sm:$0xff] }
  0x9f   : > { %1260 = vmatprep.subr.mxu1 %v499_v25  ;;  %1223 = vmatpush3.msra.mxu0 %v259_v26  ;;  %v354_v23 = vld [vmem:[%s2746_s1 + $0x520] sm:$0xff] }
  0xa0   : > { %1261 = vmatpush3.msra.mxu1 %v419_v27  ;;  %1224 = vmatprep.subr.mxu0 %v334_v28 }
  0xa1   : > { %1262 = vmatprep.subr.mxu1 %v494_v29  ;;  %1225 = vmatpush3.msra.mxu0 %v254_v30 }
  0xa2   : > { %1263 = vmatpush3.msra.mxu1 %v414_v31  ;;  %1226 = vmatprep.subr.mxu0 %v329_v32 }
  0xa3   : > { %1264 = vmatprep.subr.mxu1 %v489_v33  ;;  %1227 = vmatpush3.msra.mxu0 %v249_v34 }
  0xa4   : > { %1265 = vmatpush3.msra.mxu1 %v409_v35  ;;  %1228 = vmatprep.subr.mxu0 %v324_v36 }
  0xa5   : > { %1266 = vmatprep.subr.mxu1 %v484_v37  ;;  %1229 = vmatpush3.msra.mxu0 %v244_v38 }
  0xa6   : > { %1267 = vmatpush3.msra.mxu1 %v404_v39  ;;  %1230 = vmatprep.subr.mxu0 %v319_v40 }
  0xa7   : > { %1268 = vmatprep.subr.mxu1 %v479_v41  ;;  %1231 = vmatpush3.msra.mxu0 %v239_v42 }
  0xa8   : > { %1269 = vmatpush3.msra.mxu1 %v399_v43  ;;  %1232 = vmatprep.subr.mxu0 %v314_v44 }
  0xa9   : > { %1270 = vmatprep.subr.mxu1 %v474_v45  ;;  %1233 = vmatpush3.msra.mxu0 %v234_v46 }
  0xaa   : > { %1271 = vmatpush3.msra.mxu1 %v394_v47  ;;  %1234 = vmatprep.subr.mxu0 %v309_v48 }
  0xab   : > { %1272 = vmatprep.subr.mxu1 %v469_v49  ;;  %1235 = vmatpush3.msra.mxu0 %v229_v50 }
  0xac   : > { %1273 = vmatpush3.msra.mxu1 %v389_v51  ;;  %1236 = vmatprep.subr.mxu0 %v304_v52 }
  0xad   : > { %1274 = vmatprep.subr.mxu1 %v464_v53  ;;  %1237 = vmatpush3.msra.mxu0 %v224_v54 }
  0xae   : > { %1275 = vmatpush3.msra.mxu1 %v384_v55  ;;  %1238 = vmatprep.subr.mxu0 %v299_v56 }
  0xaf   : > { %1276 = vmatprep.subr.mxu1 %v459_v57  ;;  %1239 = vmatpush3.msra.mxu0 %v219_v58 }
  0xb0   : > { %1277 = vmatpush3.msra.mxu1 %v379_v59  ;;  %1240 = vmatprep.subr.mxu0 %v294_v62 }
  0xb1   : > { %1278 = vmatprep.subr.mxu1 %v454_v0  ;;  %1241 = vmatpush3.msra.mxu0 %v214_v6 }
  0xb2   : > { %1279 = vmatpush3.msra.mxu1 %v374_v7  ;;  %1242 = vmatprep.subr.mxu0 %v289_v8 }
  0xb3   : > { %1280 = vmatprep.subr.mxu1 %v449_v9  ;;  %734 = vmatprep.mubr.f32.mxu0 %v2374_v60 }
  0xb4   : > { %811 = vmatprep.mubr.f32.mxu1 %v2377_v61  ;;  %1243 = vmatpush3.msra.mxu0 %v209_v10 }
  0xb5   : > { %1281 = vmatpush3.msra.mxu1 %v369_v11  ;;  %735 = vmatmul.mubr.f32.gmra.mxu0 %v2386_v4 }
  0xb6   : > { %812 = vmatmul.mubr.f32.gmra.mxu1 %v2389_v5  ;;  %1244 = vmatprep.subr.mxu0 %v284_v12 }
  0xb7   : > { %1282 = vmatprep.subr.mxu1 %v444_v13  ;;  %1245 = vmatpush3.msra.mxu0 %v204_v14 }
  0xb8   : > { %1283 = vmatpush3.msra.mxu1 %v364_v15  ;;  %1246 = vmatprep.subr.mxu0 %v279_v16 }
  0xb9   : > { %1284 = vmatprep.subr.mxu1 %v439_v17  ;;  %1247 = vmatpush3.msra.mxu0 %v199_v18 }
  0xba   : > { %1285 = vmatpush3.msra.mxu1 %v359_v19  ;;  %1248 = vmatprep.subr.mxu0 %v274_v20 }
  0xbb   : > { %1286 = vmatprep.subr.mxu1 %v434_v21  ;;  %1249 = vmatpush3.msra.mxu0 %v194_v22 }
  0xbc   : > { %882 = vmatprep.mubr.f32.mxu0 %v2007_v63  ;;  %1287 = vmatpush3.msra.mxu1 %v354_v23 }
  0xbd   : > { %957 = vmatprep.mubr.f32.mxu1 %v2013_v1  ;;  %883 = vmatmul.mubr.f32.vlgmr.msra.gmra.mxu0 %v2016_v2 }
  0xbe   : > { %958 = vmatmul.mubr.f32.vlgmr.msra.gmra.mxu1 %v2019_v3  ;;  %887 = vmatprep.mubr.f32.mxu0 %v2374_v60 }
  0xbf   : > { %962 = vmatprep.mubr.f32.mxu1 %v2377_v61 }
  0xc1   : > { %888 = vmatmul.mubr.f32.gmra.mxu0 %v2386_v4 }
  0xc2   : > { %963 = vmatmul.mubr.f32.gmra.mxu1 %v2389_v5 }
 0x115   : > { %v576_v24 = vpop.f32.mrf.mxu0 }
 0x116   : > { %v653_v25 = vpop.f32.mrf.mxu1 }
 0x117   : > { %v654_v63 = vadd.f32 %v653_v25, %v576_v24  ;;  %v578_v26 = vpop.f32.mrf.mxu0 }
 0x118   : > { %v655_v27 = vpop.f32.mrf.mxu1 }
 0x119   : > { %968 = vst [vmem:[%s2634_s30] sm:$0xff] %v654_v63  ;;  %v656_v1 = vadd.f32 %v655_v27, %v578_v26 }
 0x11b   : > { %969 = vst [vmem:[%s2634_s30 + $0x8] sm:$0xff] %v656_v1 }
 0x152   : > { %v582_v2 = vpop.f32.mrf.mxu0 }
 0x153   : > { %v659_v3 = vpop.f32.mrf.mxu1 }
 0x154   : > { %v660_v60 = vadd.f32 %v659_v3, %v582_v2  ;;  %v584_v61 = vpop.f32.mrf.mxu0 }
 0x155   : > { %v661_v4 = vpop.f32.mrf.mxu1 }
 0x156   : > { %974 = vst [vmem:[%s2634_s30 + $0x28] sm:$0xff] %v660_v60  ;;  %v662_v5 = vadd.f32 %v661_v4, %v584_v61 }
 0x158   : > { %975 = vst [vmem:[%s2634_s30 + $0x30] sm:$0xff] %v662_v5 }
 0x159   : > { %v730_v28 = vpop.f32.mrf.mxu0 }
 0x15a   : > { %v807_v29 = vpop.f32.mrf.mxu1 }
 0x15b   : > { %v808_v30 = vadd.f32 %v807_v29, %v730_v28  ;;  %v732_v31 = vpop.f32.mrf.mxu0 }
 0x15c   : > { %v809_v32 = vpop.f32.mrf.mxu1 }
 0x15d   : > { %970 = vst [vmem:[%s2634_s30 + $0x10] sm:$0xff] %v808_v30  ;;  %v810_v33 = vadd.f32 %v809_v32, %v732_v31 }
 0x15f   : > { %971 = vst [vmem:[%s2634_s30 + $0x18] sm:$0xff] %v810_v33 }
 0x175   : > { %v736_v34 = vpop.f32.mrf.mxu0 }
 0x176   : > { %v813_v35 = vpop.f32.mrf.mxu1 }
 0x177   : > { %v814_v36 = vadd.f32 %v813_v35, %v736_v34  ;;  %v738_v37 = vpop.f32.mrf.mxu0 }
 0x178   : > { %v815_v38 = vpop.f32.mrf.mxu1 }
 0x179   : > { %976 = vst [vmem:[%s2634_s30 + $0x38] sm:$0xff] %v814_v36  ;;  %v816_v39 = vadd.f32 %v815_v38, %v738_v37 }
 0x17b   : > { %977 = vst [vmem:[%s2634_s30 + $0x40] sm:$0xff] %v816_v39 }
 0x17d   : > { %v1250_v40 = vpop.f32.mrf.mxu0 }
 0x17e   : > { %v1288_v41 = vpop.f32.mrf.mxu1 }
 0x17f   : > { %v1251_v42 = vpop.f32.mrf.mxu0 }
 0x180   : > { %v1289_v43 = vpop.f32.mrf.mxu1  ;;  %v1252_v44 = vadd.f32 %v1251_v42, %v1250_v40 }
 0x181   : > { %v1290_v45 = vadd.f32 %v1289_v43, %v1288_v41  ;;  %v1253_v46 = vpop.f32.mrf.mxu0 }
 0x182   : > { %v1291_v47 = vpop.f32.mrf.mxu1 }
 0x183   : > { %v960_v48 = vadd.f32 %v1290_v45, %v1252_v44  ;;  %v1254_v49 = vpop.f32.mrf.mxu0 }
 0x184   : > { %v1292_v50 = vpop.f32.mrf.mxu1  ;;  %v1255_v51 = vadd.f32 %v1254_v49, %v1253_v46 }
 0x185   : > { %973 = vst.msk [vmem:[%s2634_s30 + $0x20] sm:$0xff] %vm972_vm0, %v960_v48  ;;  %v1293_v52 = vadd.f32 %v1292_v50, %v1291_v47  ;;  %985 = sbr.rel (!%p1599_p5) target bundleno = 433 (0x1b1), region = 32 }
 0x187   : > { %v965_v53 = vadd.f32 %v1293_v52, %v1255_v51 }
 0x189   : > { %978 = vst.msk [vmem:[%s2634_s30 + $0x48] sm:$0xff] %vm972_vm0, %v965_v53 }
 0x18a   : > { %s2768_s26 = smov (!%p988_p10, %s987_s26), 2 }
 0x18b   : > { %s1206_s5 = smul.u32 640, %s2768_s26 }
 0x18d   : > { %p1210_p11 = scmp.eq.s32.totalorder %s1206_s5, 0 }
 0x18e   : > { %s2660_s20 = sshrl.u32 (!%p1210_p11), %s2768_s26, 1 }
 0x18f   : > { %1000 = sbr.rel (%p1210_p11) target bundleno = 433 (0x1b1), region = 36  ;;  %p1211_p12 = scmp.le.s32.totalorder (!%p1210_p11), %s2660_s20, 0 }
 0x194   : > { %1133 = sbr.rel (%p1211_p12) target bundleno = 417 (0x1a1), region = 88  ;;  %s2749_s11 = smov (!%p1211_p12), %s2657_s18 }
 0x195   : > { %s2750_s12 = smov (!%p1211_p12), %s2634_s30  ;;  %s2669_s7 = smov (!%p1211_p12), 0  }
 0x196   : > { %s2671_s8 = smov (!%p1211_p12), 0  }
 0x199 LB: >> { %v1013_v54 = vld [vmem:[%s1512_s12] sm:$0xff]  ;;  %v1015_v55 = vld [vmem:[%s1512_s12 + $0x28] sm:$0xff]  ;;  %s1033_s22 = sadd.s32 1, %s1516_s7  ;;  %v1019_v57 = vld [vmem:[%s1512_s12 + $0x30] sm:$0xff]  ;;  %s1007_s8 = sadd.s32 1, %s1520_s8   ;;  %s1520_s8 = sphi %s2671_s8, %s1007_s8   ;;  %s1516_s7 = sphi %s2669_s7, %s2751_s7   ;;  %s1512_s12 = sphi %s2750_s12, %s1038_s12   ;;  %s1508_s11 = sphi %s2749_s11, %s1039_s11  }
 0x19a   : >> { %v1017_v56 = vld [vmem:[%s1512_s12 + $0x8] sm:$0xff]  ;;  %1014 = vst [vmem:[%s1508_s11] sm:$0xff] %v1013_v54  ;;  %1016 = vst [vmem:[%s1508_s11 + $0x28] sm:$0xff] %v1015_v55  ;;  %v1021_v58 = vld [vmem:[%s1512_s12 + $0x10] sm:$0xff]  ;;  %p1034_p13 = scmp.ge.s32.totalorder %s1033_s22, %s2660_s20  ;;  %p1006_p0 = scmp.ge.s32.totalorder %s1007_s8, %s2660_s20 }
 0x19b   : >> { %1018 = vst [vmem:[%s1508_s11 + $0x8] sm:$0xff] %v1017_v56  ;;  %v1023_v59 = vld [vmem:[%s1512_s12 + $0x38] sm:$0xff]  ;;  %1020 = vst [vmem:[%s1508_s11 + $0x30] sm:$0xff] %v1019_v57  ;;  %v1027_v0 = vld [vmem:[%s1512_s12 + $0x40] sm:$0xff] }
 0x19c   : >> { %1022 = vst [vmem:[%s1508_s11 + $0x10] sm:$0xff] %v1021_v58  ;;  %1024 = vst [vmem:[%s1508_s11 + $0x38] sm:$0xff] %v1023_v59  ;;  %v1025_v62 = vld [vmem:[%s1512_s12 + $0x18] sm:$0xff]  ;;  %v1029_v6 = vld [vmem:[%s1512_s12 + $0x20] sm:$0xff]  ;;  %s2770_s22 = smov (%p1034_p13, %s1033_s22), 0  ;;  %1009 = sbr.rel (!%p1006_p0) target bundleno = 409 (0x199), region = 94 }
 0x19d   : >> { %1026 = vst [vmem:[%s1508_s11 + $0x18] sm:$0xff] %v1025_v62  ;;  %1028 = vst [vmem:[%s1508_s11 + $0x40] sm:$0xff] %v1027_v0  ;;  %v1031_v7 = vld [vmem:[%s1512_s12 + $0x48] sm:$0xff]  ;;  %s1036_s23 = smul.u32 80, %s2770_s22  ;;  %s2751_s7 = smov %s2770_s22 }
 0x19e   : >> { %1030 = vst [vmem:[%s1508_s11 + $0x20] sm:$0xff] %v1029_v6  ;;  %1032 = vst [vmem:[%s1508_s11 + $0x48] sm:$0xff] %v1031_v7 }
 0x19f   : >> { %s1038_s12 = scalar_lea.vmem %s2634_s30, %s1036_s23 [#allocation3]   ;;  %s1039_s11 = scalar_lea.vmem %s2657_s18, %s1036_s23  }
 0x1a1 PF: > { %s2693_s27 = sand.u32 1, %s2768_s26   ;;  %s1213_s28 = smul.u32 80, %s2660_s20 }
 0x1a2   : > { %p1215_p1 = scmp.le.s32.totalorder %s2693_s27, 0 }
 0x1a3   : > { %s2697_s29 = scalar_lea.vmem %s2634_s30, %s1213_s28 [#allocation3]   ;;  %s2700_s9 = scalar_lea.vmem %s2657_s18, %s1213_s28  }
 0x1a4   : > { %1147 = sbr.rel (%p1215_p1) target bundleno = 433 (0x1b1), region = 99  ;;  %s2752_s25 = smov (!%p1215_p1), %s2700_s9 }
 0x1a5   : > { %s2753_s19 = smov (!%p1215_p1), %s2697_s29  ;;  %s2709_s3 = smov (!%p1215_p1), 0  }
 0x1a6   : > { %s1534_s4 = smov (!%p1215_p1), 0  }
 0x1a9 LB: >> { %v1056_v8 = vld [vmem:[%s1528_s19] sm:$0xff]  ;;  %v1058_v9 = vld [vmem:[%s1528_s19 + $0x8] sm:$0xff]  ;;  %v1060_v10 = vld [vmem:[%s1528_s19 + $0x10] sm:$0xff]  ;;  %s1066_s30 = sadd.s32 1, %s1532_s3  ;;  %s1050_s4 = sadd.s32 1, %s1536_s4   ;;  %s1536_s4 = sphi %s1534_s4, %s1050_s4   ;;  %s1532_s3 = sphi %s2709_s3, %s2754_s3   ;;  %s1528_s19 = sphi %s2753_s19, %s1071_s19   ;;  %s1524_s25 = sphi %s2752_s25, %s1072_s25  }
 0x1aa   : >> { %1057 = vst [vmem:[%s1524_s25] sm:$0xff] %v1056_v8  ;;  %1059 = vst [vmem:[%s1524_s25 + $0x8] sm:$0xff] %v1058_v9  ;;  %v1062_v11 = vld [vmem:[%s1528_s19 + $0x18] sm:$0xff]  ;;  %v1064_v12 = vld [vmem:[%s1528_s19 + $0x20] sm:$0xff]  ;;  %p1067_p2 = scmp.ge.s32.totalorder %s1066_s30, %s2693_s27  ;;  %p1049_p3 = scmp.ge.s32.totalorder %s1050_s4, %s2693_s27 }
 0x1ab   : >> { %1061 = vst [vmem:[%s1524_s25 + $0x10] sm:$0xff] %v1060_v10  ;;  %1063 = vst [vmem:[%s1524_s25 + $0x18] sm:$0xff] %v1062_v11 }
 0x1ac   : >> { %1065 = vst [vmem:[%s1524_s25 + $0x20] sm:$0xff] %v1064_v12  ;;  %s2772_s30 = smov (%p1067_p2, %s1066_s30), 0  ;;  %1052 = sbr.rel (!%p1049_p3) target bundleno = 425 (0x1a9), region = 105 }
 0x1ad   : >> { %s1069_s26 = smul.u32 40, %s2772_s30  ;;  %s2754_s3 = smov %s2772_s30 }
 0x1af   : >> { %s1071_s19 = scalar_lea.vmem %s2697_s29, %s1069_s26 [#allocation3]   ;;  %s1072_s25 = scalar_lea.vmem %s2700_s9, %s1069_s26  }
 0x1b1 PF: > { %s12_s15 = sadd.s32 1, %s1504_s15   ;;  %s2755_s9 = smov %s1484_s10 }
 0x1b2   : > { %p9_p4 = scmp.ge.s32.totalorder %s12_s15, 6   ;;  %s2756_s10 = smov %s1610_s24 }
 0x1b3   : > { %s2757_s11 = smov %s1496_s13  ;;  %s2758_s12 = smov %s1500_s14 }
 0x1b4   : > { %s2759_s13 = smov %s2762_s16  ;;  %s2760_s14 = smov %s2766_s17 }
 0x1b5   :  { %11 = sbr.rel (!%p9_p4) target bundleno = 4 (0x4), region = 116 }

</bundles_post_ra>
